<compile_context>
chip_gen: v5e
topology: v5e:2x2
jax: 0.10.0
libtpu: 0.0.40
codegen_flags: <defaults>
</compile_context>

<pallas_src>
import functools

import numpy as np
import jax
import jax.numpy as jnp
from jax.experimental import pallas as pl
from jax.experimental.pallas import tpu as pltpu


def _round_up(v, m):
    return (v + m - 1) // m * m


def _padded_bytes(shape, dtype):
    """Rough VMEM footprint of an array after (8,128) tiling."""
    shape = tuple(shape)
    if len(shape) == 1:
        shape = (1,) + shape
    lead = 1
    for d in shape[:-2]:
        lead *= d
    return (lead * _round_up(shape[-2], 8) * _round_up(shape[-1], 128)
            * np.dtype(dtype).itemsize)


def _pick_batch_tile(n, hw, m_target=512):
    """Batch tile: target TB*HW ~ m_target MXU rows, prefer divisors of n
    (no padding), keep >= 2 grid steps when n > 1 (v7x dual TensorCore)."""
    want = max(1, min(n, -(-m_target // hw)))
    tb = 1
    for cand in range(want, 0, -1):
        if n % cand == 0:
            tb = cand
            break
    if 2 * tb <= want:          # no decent divisor (e.g. prime n): pad instead
        tb = want
    if n > 1 and -(-n // tb) < 2:
        tb = -(-n // 2)
    return tb


def _attn_pool_kernel(x_ref, hp_ref, hpt_ref, pcls_ref, ptok_ref,
                      wq_ref, bq_ref, wkv_ref, bkv_ref, wc_ref, bc_ref,
                      o_ref, *, num_heads, head_dim, hw, hw_pad, tb):
    f32 = jnp.float32
    bf16 = jnp.bfloat16
    c = num_heads * head_dim
    m_tok = tb * hw_pad

    # x streamed as bf16; upcast once for f32 mean / positional add.
    x = x_ref[...].astype(f32)                            # (TB, HWp, C)

    # Mean (CLS) token per batch row; pad tokens are zero so the sum is exact.
    mean_tok = jnp.sum(x, axis=1) * (1.0 / hw)            # (TB, C)
    t_cls = mean_tok + pcls_ref[...]                      # (TB, C) f32

    # Spatial tokens + positional embedding (f32), flattened lane-dense.
    t_tok = (x + ptok_ref[...][None, :, :]).reshape(m_tok, c)     # (M, C)

    # Fused k/v projection over [tokens ; CLS] rows (one MXU pass), plus a
    # single q projection on the CLS rows.  bf16 operands, f32 accumulation.
    t_all_b = jnp.concatenate([t_tok, t_cls], axis=0).astype(bf16)  # (M+TB, C)
    kv_all = (jnp.dot(t_all_b, wkv_ref[...], preferred_element_type=f32)
              + bkv_ref[...])                                        # (M+TB, 2C)
    q_cls = (jnp.dot(t_cls.astype(bf16), wq_ref[...],
                     preferred_element_type=f32) + bq_ref[...])
    q_cls = q_cls * (float(head_dim) ** -0.5)                        # (TB, C)

    k_tok = kv_all[:m_tok, :c].reshape(tb, hw_pad, c)     # (TB, HWp, C)
    v_tok = kv_all[:m_tok, c:].reshape(tb, hw_pad, c)
    k_cls = kv_all[m_tok:, :c]                            # (TB, C)
    v_cls = kv_all[m_tok:, c:]                            # (TB, C)

    # Per-head scores: elementwise q*k (VPU) + ONE head-pool matmul on the
    # row-concat of token and CLS rows.
    qk_tok = (q_cls[:, None, :] * k_tok).reshape(m_tok, c)
    qk_cls = q_cls * k_cls
    qk_all = jnp.concatenate([qk_tok, qk_cls], axis=0).astype(bf16)  # (M+TB, C)
    s_all = jnp.dot(qk_all, hp_ref[...], preferred_element_type=f32) # (M+TB, H)
    s_tok = s_all[:m_tok].reshape(tb, hw_pad, num_heads)
    s_cls = s_all[m_tok:]                                 # (TB, H)

    # Mask padded key positions out of the softmax (static no-op if HWp == HW).
    if hw_pad != hw:
        valid = (jax.lax.broadcasted_iota(jnp.int32,
                                          (tb, hw_pad, num_heads), 1) < hw)
        s_tok = jnp.where(valid, s_tok, -1e30)

    # Softmax over HW spatial keys + the CLS key, all in f32.
    m = jnp.maximum(jnp.max(s_tok, axis=1), s_cls)        # (TB, H)
    e_tok = jnp.exp(s_tok - m[:, None, :])                # (TB, HWp, H)
    e_cls = jnp.exp(s_cls - m)                            # (TB, H)
    denom = jnp.sum(e_tok, axis=1) + e_cls                # (TB, H)
    inv = pl.reciprocal(denom, approx=True)               # (TB, H)

    # Normalize probabilities per head, then ONE head->channel broadcast matmul
    # on the row-concat of token and CLS probabilities.
    p_tok = (e_tok * inv[:, None, :]).reshape(m_tok, num_heads)
    p_cls = e_cls * inv
    p_all = jnp.concatenate([p_tok, p_cls], axis=0).astype(bf16)       # (M+TB, H)
    p_full = jnp.dot(p_all, hpt_ref[...], preferred_element_type=f32)  # (M+TB, C)
    p_tok_full = p_full[:m_tok].reshape(tb, hw_pad, c)
    p_cls_full = p_full[m_tok:]

    # Weighted value sum: sublane reduction over the HW axis (pad rows have p=0).
    attn = jnp.sum(p_tok_full * v_tok, axis=1) + p_cls_full * v_cls    # (TB, C)

    # Output projection (bf16 MXU, f32 acc) -> lane-dense (TB, Dout_pad) store.
    out = (jnp.dot(attn.astype(bf16), wc_ref[...],
                   preferred_element_type=f32) + bc_ref[...])
    o_ref[0] = out.astype(o_ref.dtype)


def attention_pool_2d(x, pos, wq, bq, wk, bk, wv, bv, wc, bc, *, num_heads):
    """x: (N, C, H, W) float32. Returns (N, output_dim). Matches AttentionPool2d."""
    N, C, H, W = x.shape
    HW = H * W
    HW_pad = _round_up(HW, 8)
    Dout = wc.shape[0]
    Dout_pad = _round_up(Dout, 128)
    head_dim = C // num_heads

    TB = _pick_batch_tile(N, HW_pad)
    N_pad = _round_up(N, TB)
    n_tiles = N_pad // TB

    f32, bf16 = jnp.float32, jnp.bfloat16

    # NCHW -> (N, HW, C) channels-last bf16 tokens (transpose + cast fuse into a
    # single XLA producer pass; halves streamed-x HBM bytes vs f32).
    # TODO(synk): accept channels-last activations directly to drop this HBM pass.
    x_tok = jnp.transpose(x.reshape(N, C, HW), (0, 2, 1)).astype(bf16)
    if HW_pad != HW:
        x_tok = jnp.pad(x_tok, ((0, 0), (0, HW_pad - HW), (0, 0)))
    if N_pad != N:
        x_tok = jnp.pad(x_tok, ((0, N_pad - N), (0, 0), (0, 0)))

    # Fused, pre-transposed bf16 weights; f32 biases / positional embedding.
    # TODO(synk): for CLIP-scale C (>=1024) on v7x, K-tile the projections (or
    # store weights as fp8) instead of keeping them whole-array VMEM resident.
    wq_t = wq.T.astype(bf16)                                        # (C, C)
    wkv_t = jnp.concatenate([wk.T, wv.T], axis=1).astype(bf16)      # (C, 2C)
    wc_t = jnp.pad(wc.T.astype(f32),
                   ((0, 0), (0, Dout_pad - Dout))).astype(bf16)     # (C, Dout_pad)
    bq2 = bq.reshape(1, C).astype(f32)
    bkv2 = jnp.concatenate([bk, bv]).reshape(1, 2 * C).astype(f32)
    bc2 = jnp.pad(bc.reshape(1, Dout).astype(f32),
                  ((0, 0), (0, Dout_pad - Dout)))                   # (1, Dout_pad)
    pos_cls = pos[0:1, :].astype(f32)                               # (1, C)
    pos_tok = pos[1:, :].astype(f32)                                # (HW, C)
    if HW_pad != HW:
        pos_tok = jnp.pad(pos_tok, ((0, HW_pad - HW), (0, 0)))

    # 0/1 head-pooling matrices (exact in bf16): per-head score reduction and
    # head->channel probability broadcast become MXU matmuls.
    hp = ((jnp.arange(C)[:, None] // head_dim) ==
          jnp.arange(num_heads)[None, :]).astype(bf16)              # (C, H)
    hpt = jnp.transpose(hp)                                         # (H, C)

    kernel = functools.partial(_attn_pool_kernel, num_heads=num_heads,
                               head_dim=head_dim, hw=HW, hw_pad=HW_pad, tb=TB)

    def vmem():
        # Whole-array, grid-invariant operand resident once in VMEM.
        return pl.BlockSpec(memory_space=pltpu.MemorySpace.VMEM)

    consts = (hp, hpt, pos_cls, pos_tok, wq_t, bq2, wkv_t, bkv2, wc_t, bc2)

    # Actual residency estimate + scratch margin, capped below v7x's 64 MiB.
    vmem_bytes = (sum(_padded_bytes(a.shape, a.dtype) for a in consts)
                  + 2 * _padded_bytes((TB, HW_pad, C), bf16)   # double-buffered x
                  + 2 * _padded_bytes((1, TB, Dout_pad), f32)  # double-buffered out
                  + (8 << 20))                                 # Mosaic scratch margin
    vmem_limit = int(min(48 << 20, max(16 << 20, vmem_bytes)))

    out = pl.pallas_call(
        kernel,
        out_shape=jax.ShapeDtypeStruct((n_tiles, TB, Dout_pad), f32),
        grid_spec=pltpu.PrefetchScalarGridSpec(
            num_scalar_prefetch=0,
            grid=(n_tiles,),
            in_specs=[pl.BlockSpec((TB, HW_pad, C), lambda b: (b, 0, 0))]
                     + [vmem() for _ in consts],
            out_specs=pl.BlockSpec((1, TB, Dout_pad), lambda b: (b, 0, 0)),
        ),
        compiler_params=pltpu.CompilerParams(
            dimension_semantics=("parallel",),
            vmem_limit_bytes=vmem_limit),
    )(x_tok, *consts)

    return out.reshape(N_pad, Dout_pad)[:N, :Dout]


def attention_pool_2d_ref(x, pos, wq, bq, wk, bk, wv, bv, wc, bc, *, num_heads):
    """Pure-JAX reference mirroring the PyTorch forward exactly (f32)."""
    N, C, H, W = x.shape
    t = jnp.transpose(x.reshape(N, C, H * W), (2, 0, 1))          # (HW, N, C)
    t = jnp.concatenate([t.mean(axis=0, keepdims=True), t], 0)    # (L, N, C)
    t = t + pos[:, None, :]
    L = t.shape[0]
    hd = C // num_heads
    q = t @ wq.T + bq
    k = t @ wk.T + bk
    v = t @ wv.T + bv
    q = q * (hd ** -0.5)
    qh = q.reshape(L, N, num_heads, hd)
    kh = k.reshape(L, N, num_heads, hd)
    vh = v.reshape(L, N, num_heads, hd)
    s = jnp.einsum('qnhd,knhd->nhqk', qh, kh)
    p = jax.nn.softmax(s, axis=-1)
    o = jnp.einsum('nhqk,knhd->qnhd', p, vh).reshape(L, N, C)
    out = o @ wc.T + bc
    return out[0]                                                  # (N, Dout)


if __name__ == "__main__":
    # Module config (small): spacial_dim=8, embed_dim=32, num_heads=4, output_dim=16
    N, C, H, W = 2, 32, 8, 8
    num_heads = 4
    Dout = 16
    L = H * W + 1

    key = jax.random.PRNGKey(0)
    ks = jax.random.split(key, 10)
    pos = jax.random.normal(ks[0], (L, C), jnp.float32) / (C ** 0.5)
    wq = jax.random.normal(ks[1], (C, C), jnp.float32) * 0.1
    bq = jax.random.normal(ks[2], (C,), jnp.float32) * 0.1
    wk = jax.random.normal(ks[3], (C, C), jnp.float32) * 0.1
    bk = jax.random.normal(ks[4], (C,), jnp.float32) * 0.1
    wv = jax.random.normal(ks[5], (C, C), jnp.float32) * 0.1
    bv = jax.random.normal(ks[6], (C,), jnp.float32) * 0.1
    wc = jax.random.normal(ks[7], (Dout, C), jnp.float32) * 0.1
    bc = jax.random.normal(ks[8], (Dout,), jnp.float32) * 0.1
    x = jax.random.normal(ks[9], (N, C, H, W), jnp.float32)

    out = attention_pool_2d(x, pos, wq, bq, wk, bk, wv, bv, wc, bc,
                            num_heads=num_heads)
    out = jax.block_until_ready(out)

    ref = attention_pool_2d_ref(x, pos, wq, bq, wk, bk, wv, bv, wc, bc,
                                num_heads=num_heads)
    assert out.shape == (N, Dout)
    max_err = jnp.max(jnp.abs(out - ref))
    # bf16 x / bf16 MXU operands (f32 accumulation, softmax) -> loosened tolerance.
    assert jnp.allclose(out, ref, rtol=2e-2, atol=2e-2), (
        f"max abs err {max_err}")
    print("KERNEL_OK")
</pallas_src>

<mosaic_0001>
module attributes {stable_mosaic.version = 11 : i64} {
  func.func @_attn_pool_kernel(%arg0: i32, %arg1: memref<1x64x32xbf16, #tpu.memory_space<vmem>>, %arg2: memref<32x4xbf16, #tpu.memory_space<vmem>>, %arg3: memref<4x32xbf16, #tpu.memory_space<vmem>>, %arg4: memref<1x32xf32, #tpu.memory_space<vmem>>, %arg5: memref<64x32xf32, #tpu.memory_space<vmem>>, %arg6: memref<32x32xbf16, #tpu.memory_space<vmem>>, %arg7: memref<1x32xf32, #tpu.memory_space<vmem>>, %arg8: memref<32x64xbf16, #tpu.memory_space<vmem>>, %arg9: memref<1x64xf32, #tpu.memory_space<vmem>>, %arg10: memref<32x128xbf16, #tpu.memory_space<vmem>>, %arg11: memref<1x128xf32, #tpu.memory_space<vmem>>, %arg12: memref<1x1x128xf32, #tpu.memory_space<vmem>>) attributes {dimension_semantics = [#tpu.dimension_semantics<parallel>], iteration_bounds = array<i64: 2>, scalar_prefetch = 0 : i64, scratch_operands = 0 : i64, tpu.core_type = #tpu.core_type<tc>, window_params = [{transform_indices = @transform_0, window_bounds = array<i64: 1, 64, 32>}, {pipeline_mode = #tpu.pipeline_mode<synchronous>, transform_indices = @transform_1, window_bounds = array<i64: 32, 4>}, {pipeline_mode = #tpu.pipeline_mode<synchronous>, transform_indices = @transform_2, window_bounds = array<i64: 4, 32>}, {pipeline_mode = #tpu.pipeline_mode<synchronous>, transform_indices = @transform_3, window_bounds = array<i64: 1, 32>}, {pipeline_mode = #tpu.pipeline_mode<synchronous>, transform_indices = @transform_4, window_bounds = array<i64: 64, 32>}, {pipeline_mode = #tpu.pipeline_mode<synchronous>, transform_indices = @transform_5, window_bounds = array<i64: 32, 32>}, {pipeline_mode = #tpu.pipeline_mode<synchronous>, transform_indices = @transform_6, window_bounds = array<i64: 1, 32>}, {pipeline_mode = #tpu.pipeline_mode<synchronous>, transform_indices = @transform_7, window_bounds = array<i64: 32, 64>}, {pipeline_mode = #tpu.pipeline_mode<synchronous>, transform_indices = @transform_8, window_bounds = array<i64: 1, 64>}, {pipeline_mode = #tpu.pipeline_mode<synchronous>, transform_indices = @transform_9, window_bounds = array<i64: 32, 128>}, {pipeline_mode = #tpu.pipeline_mode<synchronous>, transform_indices = @transform_10, window_bounds = array<i64: 1, 128>}, {transform_indices = @transform_11, window_bounds = array<i64: 1, 1, 128>}]} {
    %c0 = arith.constant 0 : index
    %c0_0 = arith.constant 0 : index
    %c0_1 = arith.constant 0 : index
    %0 = vector.load %arg1[%c0, %c0_0, %c0_1] : memref<1x64x32xbf16, #tpu.memory_space<vmem>>, vector<1x64x32xbf16>
    %1 = arith.extf %0 : vector<1x64x32xbf16> to vector<1x64x32xf32>
    %cst = arith.constant dense<0.000000e+00> : vector<1x32xf32>
    %2 = vector.multi_reduction <add>, %1, %cst [1] : vector<1x64x32xf32> to vector<1x32xf32>
    %cst_2 = arith.constant 1.562500e-02 : f32
    %3 = vector.broadcast %cst_2 : f32 to vector<1x32xf32>
    %4 = arith.mulf %2, %3 : vector<1x32xf32>
    %c0_3 = arith.constant 0 : index
    %c0_4 = arith.constant 0 : index
    %5 = vector.load %arg4[%c0_3, %c0_4] : memref<1x32xf32, #tpu.memory_space<vmem>>, vector<1x32xf32>
    %6 = arith.addf %4, %5 : vector<1x32xf32>
    %c0_5 = arith.constant 0 : index
    %c0_6 = arith.constant 0 : index
    %7 = vector.load %arg5[%c0_5, %c0_6] : memref<64x32xf32, #tpu.memory_space<vmem>>, vector<64x32xf32>
    %8 = vector.shape_cast %7 : vector<64x32xf32> to vector<1x64x32xf32>
    %9 = arith.addf %1, %8 : vector<1x64x32xf32>
    %10 = vector.shape_cast %9 : vector<1x64x32xf32> to vector<64x32xf32>
    %11 = tpu.concatenate %10, %6 in 0 : vector<64x32xf32>, vector<1x32xf32> -> vector<65x32xf32>
    %12 = arith.truncf %11 : vector<65x32xf32> to vector<65x32xbf16>
    %c0_7 = arith.constant 0 : index
    %c0_8 = arith.constant 0 : index
    %13 = vector.load %arg8[%c0_7, %c0_8] : memref<32x64xbf16, #tpu.memory_space<vmem>>, vector<32x64xbf16>
    %cst_9 = arith.constant dense<0.000000e+00> : vector<65x64xf32>
    %14 = tpu.matmul %12, %13, %cst_9 {dimension_numbers = #tpu.dot_dimension_numbers<[1], [0], [0], [1], [0, 0, 1, 1], [], []>} : vector<65x32xbf16>, vector<32x64xbf16>, vector<65x64xf32> -> vector<65x64xf32>
    %c0_10 = arith.constant 0 : index
    %c0_11 = arith.constant 0 : index
    %15 = vector.load %arg9[%c0_10, %c0_11] : memref<1x64xf32, #tpu.memory_space<vmem>>, vector<1x64xf32>
    %16 = vector.broadcast %15 : vector<1x64xf32> to vector<65x64xf32>
    %17 = arith.addf %14, %16 : vector<65x64xf32>
    %18 = arith.truncf %6 : vector<1x32xf32> to vector<1x32xbf16>
    %c0_12 = arith.constant 0 : index
    %c0_13 = arith.constant 0 : index
    %19 = vector.load %arg6[%c0_12, %c0_13] : memref<32x32xbf16, #tpu.memory_space<vmem>>, vector<32x32xbf16>
    %cst_14 = arith.constant dense<0.000000e+00> : vector<1x32xf32>
    %20 = tpu.matmul %18, %19, %cst_14 {dimension_numbers = #tpu.dot_dimension_numbers<[1], [0], [0], [1], [0, 0, 1, 1], [], []>} : vector<1x32xbf16>, vector<32x32xbf16>, vector<1x32xf32> -> vector<1x32xf32>
    %c0_15 = arith.constant 0 : index
    %c0_16 = arith.constant 0 : index
    %21 = vector.load %arg7[%c0_15, %c0_16] : memref<1x32xf32, #tpu.memory_space<vmem>>, vector<1x32xf32>
    %22 = arith.addf %20, %21 : vector<1x32xf32>
    %cst_17 = arith.constant 0.353553385 : f32
    %23 = vector.broadcast %cst_17 : f32 to vector<1x32xf32>
    %24 = arith.mulf %22, %23 : vector<1x32xf32>
    %25 = vector.extract_strided_slice %17 {offsets = [0, 0], sizes = [64, 32], strides = [1, 1]} : vector<65x64xf32> to vector<64x32xf32>
    %26 = vector.shape_cast %25 : vector<64x32xf32> to vector<1x64x32xf32>
    %27 = vector.extract_strided_slice %17 {offsets = [0, 32], sizes = [64, 32], strides = [1, 1]} : vector<65x64xf32> to vector<64x32xf32>
    %28 = vector.shape_cast %27 : vector<64x32xf32> to vector<1x64x32xf32>
    %29 = vector.extract_strided_slice %17 {offsets = [64, 0], sizes = [1, 32], strides = [1, 1]} : vector<65x64xf32> to vector<1x32xf32>
    %30 = vector.extract_strided_slice %17 {offsets = [64, 32], sizes = [1, 32], strides = [1, 1]} : vector<65x64xf32> to vector<1x32xf32>
    %31 = vector.shape_cast %24 : vector<1x32xf32> to vector<1x1x32xf32>
    %32 = vector.broadcast %31 : vector<1x1x32xf32> to vector<1x64x32xf32>
    %33 = arith.mulf %32, %26 : vector<1x64x32xf32>
    %34 = vector.shape_cast %33 : vector<1x64x32xf32> to vector<64x32xf32>
    %35 = arith.mulf %24, %29 : vector<1x32xf32>
    %36 = tpu.concatenate %34, %35 in 0 : vector<64x32xf32>, vector<1x32xf32> -> vector<65x32xf32>
    %37 = arith.truncf %36 : vector<65x32xf32> to vector<65x32xbf16>
    %c0_18 = arith.constant 0 : index
    %c0_19 = arith.constant 0 : index
    %38 = vector.load %arg2[%c0_18, %c0_19] : memref<32x4xbf16, #tpu.memory_space<vmem>>, vector<32x4xbf16>
    %cst_20 = arith.constant dense<0.000000e+00> : vector<65x4xf32>
    %39 = tpu.matmul %37, %38, %cst_20 {dimension_numbers = #tpu.dot_dimension_numbers<[1], [0], [0], [1], [0, 0, 1, 1], [], []>} : vector<65x32xbf16>, vector<32x4xbf16>, vector<65x4xf32> -> vector<65x4xf32>
    %40 = vector.extract_strided_slice %39 {offsets = [0, 0], sizes = [64, 4], strides = [1, 1]} : vector<65x4xf32> to vector<64x4xf32>
    %41 = vector.shape_cast %40 : vector<64x4xf32> to vector<1x64x4xf32>
    %42 = vector.extract_strided_slice %39 {offsets = [64, 0], sizes = [1, 4], strides = [1, 1]} : vector<65x4xf32> to vector<1x4xf32>
    %cst_21 = arith.constant dense<0xFF800000> : vector<1x4xf32>
    %43 = vector.multi_reduction <maximumf>, %41, %cst_21 [1] : vector<1x64x4xf32> to vector<1x4xf32>
    %44 = arith.maximumf %43, %42 : vector<1x4xf32>
    %45 = vector.shape_cast %44 : vector<1x4xf32> to vector<1x1x4xf32>
    %46 = vector.broadcast %45 : vector<1x1x4xf32> to vector<1x64x4xf32>
    %47 = arith.subf %41, %46 : vector<1x64x4xf32>
    %48 = math.exp %47 : vector<1x64x4xf32>
    %49 = arith.subf %42, %44 : vector<1x4xf32>
    %50 = math.exp %49 : vector<1x4xf32>
    %cst_22 = arith.constant dense<0.000000e+00> : vector<1x4xf32>
    %51 = vector.multi_reduction <add>, %48, %cst_22 [1] : vector<1x64x4xf32> to vector<1x4xf32>
    %52 = arith.addf %51, %50 : vector<1x4xf32>
    %53 = tpu.reciprocal %52 {approx = true} : vector<1x4xf32> -> vector<1x4xf32>
    %54 = vector.shape_cast %53 : vector<1x4xf32> to vector<1x1x4xf32>
    %55 = vector.broadcast %54 : vector<1x1x4xf32> to vector<1x64x4xf32>
    %56 = arith.mulf %48, %55 : vector<1x64x4xf32>
    %57 = vector.shape_cast %56 : vector<1x64x4xf32> to vector<64x4xf32>
    %58 = arith.mulf %50, %53 : vector<1x4xf32>
    %59 = tpu.concatenate %57, %58 in 0 : vector<64x4xf32>, vector<1x4xf32> -> vector<65x4xf32>
    %60 = arith.truncf %59 : vector<65x4xf32> to vector<65x4xbf16>
    %c0_23 = arith.constant 0 : index
    %c0_24 = arith.constant 0 : index
    %61 = vector.load %arg3[%c0_23, %c0_24] : memref<4x32xbf16, #tpu.memory_space<vmem>>, vector<4x32xbf16>
    %cst_25 = arith.constant dense<0.000000e+00> : vector<65x32xf32>
    %62 = tpu.matmul %60, %61, %cst_25 {dimension_numbers = #tpu.dot_dimension_numbers<[1], [0], [0], [1], [0, 0, 1, 1], [], []>} : vector<65x4xbf16>, vector<4x32xbf16>, vector<65x32xf32> -> vector<65x32xf32>
    %63 = vector.extract_strided_slice %62 {offsets = [0, 0], sizes = [64, 32], strides = [1, 1]} : vector<65x32xf32> to vector<64x32xf32>
    %64 = vector.shape_cast %63 : vector<64x32xf32> to vector<1x64x32xf32>
    %65 = vector.extract_strided_slice %62 {offsets = [64, 0], sizes = [1, 32], strides = [1, 1]} : vector<65x32xf32> to vector<1x32xf32>
    %66 = arith.mulf %64, %28 : vector<1x64x32xf32>
    %cst_26 = arith.constant dense<0.000000e+00> : vector<1x32xf32>
    %67 = vector.multi_reduction <add>, %66, %cst_26 [1] : vector<1x64x32xf32> to vector<1x32xf32>
    %68 = arith.mulf %65, %30 : vector<1x32xf32>
    %69 = arith.addf %67, %68 : vector<1x32xf32>
    %70 = arith.truncf %69 : vector<1x32xf32> to vector<1x32xbf16>
    %c0_27 = arith.constant 0 : index
    %c0_28 = arith.constant 0 : index
    %71 = vector.load %arg10[%c0_27, %c0_28] : memref<32x128xbf16, #tpu.memory_space<vmem>>, vector<32x128xbf16>
    %cst_29 = arith.constant dense<0.000000e+00> : vector<1x128xf32>
    %72 = tpu.matmul %70, %71, %cst_29 {dimension_numbers = #tpu.dot_dimension_numbers<[1], [0], [0], [1], [0, 0, 1, 1], [], []>} : vector<1x32xbf16>, vector<32x128xbf16>, vector<1x128xf32> -> vector<1x128xf32>
    %c0_30 = arith.constant 0 : index
    %c0_31 = arith.constant 0 : index
    %73 = vector.load %arg11[%c0_30, %c0_31] : memref<1x128xf32, #tpu.memory_space<vmem>>, vector<1x128xf32>
    %74 = arith.addf %72, %73 : vector<1x128xf32>
    %c0_32 = arith.constant 0 : index
    %c0_33 = arith.constant 0 : index
    %c0_34 = arith.constant 0 : index
    %75 = vector.load %arg12[%c0_32, %c0_33, %c0_34] : memref<1x1x128xf32, #tpu.memory_space<vmem>>, vector<1x1x128xf32>
    %76 = vector.shape_cast %75 : vector<1x1x128xf32> to vector<1x128xf32>
    %77 = vector.shape_cast %74 : vector<1x128xf32> to vector<1x1x128xf32>
    tpu.vector_store %arg12[%c0_32, %c0_33, %c0_34], %77 {strides = array<i32>} : memref<1x1x128xf32, #tpu.memory_space<vmem>>, vector<1x1x128xf32>,
    return
  }
  func.func @transform_0(%arg0: i32) -> (i32, i32, i32) {
    %c0_i32 = arith.constant 0 : i32
    %c0_i32_0 = arith.constant 0 : i32
    %c0_i32_1 = arith.constant 0 : i32
    return %arg0, %c0_i32, %c0_i32_0 : i32, i32, i32
  }
  func.func @transform_1(%arg0: i32) -> (i32, i32) {
    %c0_i32 = arith.constant 0 : i32
    %c0_i32_0 = arith.constant 0 : i32
    %c0_i32_1 = arith.constant 0 : i32
    return %c0_i32, %c0_i32_0 : i32, i32
  }
  func.func @transform_2(%arg0: i32) -> (i32, i32) {
    %c0_i32 = arith.constant 0 : i32
    %c0_i32_0 = arith.constant 0 : i32
    %c0_i32_1 = arith.constant 0 : i32
    return %c0_i32, %c0_i32_0 : i32, i32
  }
  func.func @transform_3(%arg0: i32) -> (i32, i32) {
    %c0_i32 = arith.constant 0 : i32
    %c0_i32_0 = arith.constant 0 : i32
    %c0_i32_1 = arith.constant 0 : i32
    return %c0_i32, %c0_i32_0 : i32, i32
  }
  func.func @transform_4(%arg0: i32) -> (i32, i32) {
    %c0_i32 = arith.constant 0 : i32
    %c0_i32_0 = arith.constant 0 : i32
    %c0_i32_1 = arith.constant 0 : i32
    return %c0_i32, %c0_i32_0 : i32, i32
  }
  func.func @transform_5(%arg0: i32) -> (i32, i32) {
    %c0_i32 = arith.constant 0 : i32
    %c0_i32_0 = arith.constant 0 : i32
    %c0_i32_1 = arith.constant 0 : i32
    return %c0_i32, %c0_i32_0 : i32, i32
  }
  func.func @transform_6(%arg0: i32) -> (i32, i32) {
    %c0_i32 = arith.constant 0 : i32
    %c0_i32_0 = arith.constant 0 : i32
    %c0_i32_1 = arith.constant 0 : i32
    return %c0_i32, %c0_i32_0 : i32, i32
  }
  func.func @transform_7(%arg0: i32) -> (i32, i32) {
    %c0_i32 = arith.constant 0 : i32
    %c0_i32_0 = arith.constant 0 : i32
    %c0_i32_1 = arith.constant 0 : i32
    return %c0_i32, %c0_i32_0 : i32, i32
  }
  func.func @transform_8(%arg0: i32) -> (i32, i32) {
    %c0_i32 = arith.constant 0 : i32
    %c0_i32_0 = arith.constant 0 : i32
    %c0_i32_1 = arith.constant 0 : i32
    return %c0_i32, %c0_i32_0 : i32, i32
  }
  func.func @transform_9(%arg0: i32) -> (i32, i32) {
    %c0_i32 = arith.constant 0 : i32
    %c0_i32_0 = arith.constant 0 : i32
    %c0_i32_1 = arith.constant 0 : i32
    return %c0_i32, %c0_i32_0 : i32, i32
  }
  func.func @transform_10(%arg0: i32) -> (i32, i32) {
    %c0_i32 = arith.constant 0 : i32
    %c0_i32_0 = arith.constant 0 : i32
    %c0_i32_1 = arith.constant 0 : i32
    return %c0_i32, %c0_i32_0 : i32, i32
  }
  func.func @transform_11(%arg0: i32) -> (i32, i32, i32) {
    %c0_i32 = arith.constant 0 : i32
    %c0_i32_0 = arith.constant 0 : i32
    %c0_i32_1 = arith.constant 0 : i32
    return %arg0, %c0_i32, %c0_i32_0 : i32, i32, i32
  }
}

</mosaic_0001>

<bundles_post_ra>
// kernel: tpu_custom_call.1
= control target key start
LH: loop header
LB: loop body
LE: loop exit
PB: predicated region body
PF: predicated region fallthrough
CT: control target
= control target key end

     0   :  { %16 = vsyncpa [#allocation3], 0  ;;  %s1414_s0 = inlined_call_operand.vmem [shape: bf16[2,64,32], index: 0, kind: input, shape index: {}]   ;;  %s1415_s1 = inlined_call_operand.vmem [shape: bf16[32,4], index: 1, kind: input, shape index: {}]   ;;  %s1416_s2 = inlined_call_operand.vmem [shape: bf16[4,32], index: 2, kind: input, shape index: {}]   ;;  %s1417_s3 = inlined_call_operand.vmem [shape: f32[1,32], index: 3, kind: input, shape index: {}]   ;;  %s1418_s4 = inlined_call_operand.vmem [shape: f32[64,32], index: 4, kind: input, shape index: {}]   ;;  %s1419_s5 = inlined_call_operand.vmem [shape: bf16[32,32], index: 5, kind: input, shape index: {}]   ;;  %s1420_s6 = inlined_call_operand.vmem [shape: f32[1,32], index: 6, kind: input, shape index: {}]   ;;  %s1421_s7 = inlined_call_operand.vmem [shape: bf16[32,64], index: 7, kind: input, shape index: {}]   ;;  %s1422_s8 = inlined_call_operand.vmem [shape: f32[1,64], index: 8, kind: input, shape index: {}]   ;;  %s1423_s9 = inlined_call_operand.vmem [shape: bf16[32,128], index: 9, kind: input, shape index: {}]   ;;  %s1424_s10 = inlined_call_operand.vmem [shape: f32[1,128], index: 10, kind: input, shape index: {}]   ;;  %s1425_s11 = inlined_call_operand.hbm [shape: f32[2,1,128], index: 11, kind: output, shape index: {}]  }
   0x1   :  { %18 = vsyncpa [#allocation3 + $0x1], 0  ;;  %s1208_s17 = smov 0   ;;  %s1210_s18 = smov 0  }
   0x2   :  { %s1212_s19 = smov 0   ;;  %s1214_s20 = smov 0  }
   0x3 LB: > { %1429 = sst [smem:[#allocation5_spill]] %s1141_s19  ;;  %s1229_s21 = sadd.s32 4294967295, %s1145_s20   ;;  %s1145_s20 = sphi %s1214_s20, %s1434_s20   ;;  %s1141_s19 = sphi %s1212_s19, %s1436_s19   ;;  %s1137_s18 = sphi %s1210_s18, %s1438_s18   ;;  %s1133_s17 = sphi %s1208_s17, %s1437_s17  }
   0x4   : > { %s937_s22 = sadd.s32 4294967294, %s1145_s20   ;;  %s1233_s23 = sadd.s32 1, %s1145_s20  }
   0x5   : > { %1430 = sst [smem:[#allocation6_spill]] %s1233_s23  ;;  %s267_s24 = sadd.s32 1, %s1141_s19 }
   0x6   : > { %s264_s25 = ssub.s32 %s1145_s20, %s1233_s23  ;;  %p277_p0 = scmp.ne.s32.totalorder %s1141_s19, %s1137_s18 }
   0x7   : > { %p265_p1 = scmp.eq.s32.totalorder %s264_s25, 0  ;;  %p278_p2 = scmp.eq.s32.totalorder %s1229_s21, 1 }
   0x8   : > { %p283_p3 = scmp.ne.s32.totalorder %s1137_s18, %s1133_s17  ;;  %p284_p4 = scmp.eq.s32.totalorder %s937_s22, 1 }
   0x9   : > { %s1244_s26 = scalar_select %p265_p1, %s1141_s19, %s267_s24  }
   0xa   : > { %p1246_p5 = por %p278_p2, %p277_p0  ;;  %p1250_p6 = por %p284_p4, %p283_p3 }
   0xb   : > { %1431 = sst [smem:[#allocation7_spill]] %s1244_s26  ;;  %p940_p7 = scmp.ge.s32.totalorder %s1145_s20, 1 }
   0xc   : > { %p340_p8 = scmp.lt.s32.totalorder %s1145_s20, 3 }
   0xe   : > { %p341_p9 = pnand %p940_p7, %p340_p8 }
   0xf   : > { %p379_p10 = scmp.lt.s32.totalorder (!%p341_p9), %s1229_s21, 1  ;;  %s1147_s16 = smov (!%p341_p9), 96  }
  0x10   : > { %344 = sbr.rel (%p341_p9) target bundleno = 805 (0x325), region = 64  ;;  %s1103_s15 = scalar_lea.hbm (!%p341_p9), %s1425_s11, 2 }
  0x15   : > { %v996_v0 = vld [vmem:[%s1421_s7 + $0x8] sm:$0xff]  ;;  %v995_v1 = vld [vmem:[%s1421_s7] sm:$0xff]  ;;  %s380_s14 = scalar_select %p379_p10, %s1229_s21, 1  ;;  %vm401_vm0 = vcmask 261120   ;;  %v428_v33 = vld [vmem:[%s1418_s4 + $0x10] sm:$0xff]  ;;  %vm625_vm1 = vcmask 31744  }
  0x16   : > { %488 = vmatpush.bf16.msra.mxu0 %v996_v0  ;;  %v998_v2 = vld [vmem:[%s1419_s5 + $0x8] sm:$0xff]  ;;  %v997_v3 = vld [vmem:[%s1419_s5] sm:$0xff]  ;;  %v429_v34 = vld [vmem:[%s1418_s4 + $0x18] sm:$0xff]  ;;  %vm730_vm2 = vcmask 1041408  }
  0x17   : > { %s994_s22 = sshll.u32 %s380_s14, 5  ;;  %538 = vmatpush.bf16.msra.mxu1 %v998_v2  ;;  %v426_v4 = vld [vmem:[%s1418_s4] sm:$0xff]  ;;  %v427_v5 = vld [vmem:[%s1418_s4 + $0x8] sm:$0xff]  ;;  %v432_v56 = vld [vmem:[%s1418_s4 + $0x30] sm:$0xff]  ;;  %s377_s14 = sand.u32 1, %s1137_s18  }
  0x18   : > { %s383_s26 = scalar_lea.vmem %s1414_s0, %s994_s22  ;;  %v430_v47 = vld [vmem:[%s1418_s4 + $0x20] sm:$0xff]  ;;  %v431_v48 = vld [vmem:[%s1418_s4 + $0x28] sm:$0xff]  ;;  %v433_v57 = vld [vmem:[%s1418_s4 + $0x38] sm:$0xff]  ;;  %s878_s22 = scalar_lea.hbm %s1425_s11, %s1229_s21 }
  0x19   : > { %v1004_v6 = vld [vmem:[%s383_s26] sm:$0xff]   ;;  %v1019_v7 = vld [vmem:[%s383_s26 + $0x8] sm:$0xff]   ;;  %v1020_v8 = vld [vmem:[%s383_s26 + $0x10] sm:$0xff]   ;;  %s378_s29 = scalar_lea.vmem [#allocation2], %s377_s14  ;;  %s882_s12 = sshll.u32 %s878_s22, 4  ;;  %s883_s12 = int_to_ptr.hbm [resolvable:$true] %s882_s12 }
  0x1a   : > { %489 = vmatpush.bf16.msra.mxu0 %v995_v1  ;;  %v1005_v9 = vunpack.c.l.bf16 %v1004_v6  ;;  %v1006_v10 = vunpack.c.h.bf16 %v1004_v6  ;;  %v1009_v11 = vunpack.c.l.bf16 %v1019_v7  ;;  %v1010_v12 = vunpack.c.h.bf16 %v1019_v7  ;;  %v1021_v20 = vld [vmem:[%s383_s26 + $0x18] sm:$0xff]   ;;  %v424_v49 = vld [vmem:[%s1417_s3] sm:$0x1]  ;;  %v1000_v62 = vld [vmem:[%s1415_s1 + $0x8] sm:$0xff]  ;;  %s880_s30 = sshll.u32 %s378_s29, 4  ;;  %s870_s13 = scalar_lea.sflag [#allocation3], %s377_s14  ;;  %s881_s30 = int_to_ptr.vmem [resolvable:$true] %s880_s30 }
  0x1b   : > { %v1013_v13 = vunpack.c.l.bf16 %v1020_v8  ;;  %539 = vmatpush.bf16.msra.mxu1 %v997_v3  ;;  %v1014_v22 = vunpack.c.h.bf16 %v1020_v8  ;;  %v1017_v26 = vunpack.c.l.bf16 %v1021_v20  ;;  %v1018_v29 = vunpack.c.h.bf16 %v1021_v20  ;;  %v1062_v61 = vld [vmem:[%s1422_s8] ss:$0 sm:$0xff]  ;;  %598 = vmatpush.bf16.msra.mxu2 %v1000_v62  ;;  %s1097_s19 = sshra.s32 %s883_s12, 4  ;;  %s1098_s19 = int_to_ptr.hbm [resolvable:$true] %s1097_s19 }
  0x1c   : > { %v402_v14 = vsel %vm401_vm0, %v1005_v9, 0.0  ;;  %v403_v15 = vsel %vm401_vm0, %v1006_v10, 0.0  ;;  %v434_v16 = vadd.f32 %v1005_v9, %v426_v4  ;;  %v435_v17 = vadd.f32 %v1006_v10, %v427_v5  ;;  %v999_v1 = vld [vmem:[%s1415_s1] sm:$0xff]  ;;  %s1099_s23 = scalar_lea.hbm %s1098_s19, 1  ;;  %p1104_p0 = scmp.lt.s32.totalorder %s1098_s19, %s1425_s11 }
  0x1d   : > { %v404_v18 = vadd.f32 %v403_v15, %v402_v14  ;;  %v405_v19 = vsel %vm401_vm0, %v1009_v11, 0.0  ;;  %v407_v23 = vsel %vm401_vm0, %v1010_v12, 0.0  ;;  %v409_v25 = vsel %vm401_vm0, %v1013_v13, 0.0  ;;  %v519_v8 = vld [vmem:[%s1420_s6] sm:$0x1]  ;;  %p1100_p11 = scmp.ne.s32.totalorder %s1098_s19, %s1099_s23  ;;  %p1105_p1 = scmp.lt.s32.totalorder %s1103_s15, %s1099_s23 }
  0x1e   : > { %v442_v21 = vpack.c.bf16 %v435_v17, %v434_v16  ;;  %v411_v28 = vsel %vm401_vm0, %v1014_v22, 0.0  ;;  %v413_v31 = vsel %vm401_vm0, %v1017_v26, 0.0  ;;  %v415_v35 = vsel %vm401_vm0, %v1018_v29, 0.0 }
  0x1f   : > { %v406_v24 = vadd.f32 %v405_v19, %v404_v18  ;;  %v436_v37 = vadd.f32 %v1009_v11, %v428_v33  ;;  %v437_v38 = vadd.f32 %v1010_v12, %v429_v34  ;;  %v438_v51 = vadd.f32 %v1013_v13, %v430_v47  ;;  %599 = vmatpush.bf16.msra.mxu2 %v999_v1  ;;  %p1101_p12 = pnand %p1100_p11, %p1246_p5  ;;  %p1106_p2 = por %p1105_p1, %p1104_p0 }
  0x20   : > { %951 = vmatmul.msk.bf16.vlgmr.msra.gmra.mxu0 %vm401_vm0, %v442_v21  ;;  %v439_v52 = vadd.f32 %v1014_v22, %v431_v48  ;;  %v440_v58 = vadd.f32 %v1017_v26, %v432_v56  ;;  %v441_v59 = vadd.f32 %v1018_v29, %v433_v57 }
  0x21   : > { %v408_v27 = vadd.f32 %v407_v23, %v406_v24  ;;  %v443_v41 = vpack.c.bf16 %v437_v38, %v436_v37  ;;  %p1102_p13 = pneg %p1101_p12 }
  0x22   : > { %v444_v55 = vpack.c.bf16 %v439_v52, %v438_v51  ;;  %v445_v60 = vpack.c.bf16 %v441_v59, %v440_v58 }
  0x23   : > { %v410_v30 = vadd.f32 %v409_v25, %v408_v27  ;;  %p1107_p3 = pnand %p1106_p2, %p1102_p13 }
  0x25   : > { %v412_v32 = vadd.f32 %v411_v28, %v410_v30 }
  0x27   : > { %v414_v36 = vadd.f32 %v413_v31, %v412_v32 }
  0x29   : > { %v416_v39 = vadd.f32 %v415_v35, %v414_v36 }
  0x2b   : > { %v417_v40 = vrot.slane %v416_v39, 4 }
  0x2d   : > { %v418_v42 = vadd.f32 %v417_v40, %v416_v39 }
  0x2f   : > { %v419_v43 = vrot.slane %v418_v42, 2 }
  0x30   : > { %952 = vmatmul.msk.bf16.gmra.mxu0 %vm401_vm0, %v443_v41 }
  0x31   : > { %v420_v44 = vadd.f32 %v419_v43, %v418_v42 }
  0x33   : > { %v421_v45 = vrot.slane %v420_v44, 1 }
  0x35   : > { %v422_v46 = vadd.f32 %v421_v45, %v420_v44 }
  0x37   : > { %v423_v50 = vmul.f32 0.015625, %v422_v46 }
  0x39   : > { %v425_v53 = vadd.f32 %v424_v49, %v423_v50 }
  0x3b   : > { %v446_v54 = vpack.c.bf16 %v425_v53, %v425_v53 }
  0x3d   : > { %964 = vmatmul.msk.bf16.vlgmr.msra.gmra.mxu1 %vm401_vm0, %v446_v54 }
  0x40   : > { %953 = vmatmul.msk.bf16.gmra.mxu0 %vm401_vm0, %v444_v55 }
  0x50   : > { %954 = vmatmul.msk.bf16.gmra.mxu0 %vm401_vm0, %v445_v60 }
  0x60   : > { %955 = vmatmul.msk.bf16.gmra.mxu0 %vm401_vm0, %v446_v54 }
  0x9d   : > { %v491_v63 = vpop.f32.mrf.mxu0 }
  0x9e   : > { %v492_v0 = vadd.f32 %v1062_v61, %v491_v63 }
  0xa0   : > { %775 = vrot.lane.b32.xlu0 %v492_v0, %s1147_s16 }
  0xa5   : > { %v493_v2 = vpop.f32.mrf.mxu0 }
  0xa6   : > { %v494_v3 = vadd.f32 %v1062_v61, %v493_v2 }
  0xa8   : > { %777 = vrot.lane.b32.xlu0 %v494_v3, %s1147_s16 }
  0xad   : > { %v496_v4 = vpop.f32.mrf.mxu0 }
  0xae   : > { %v497_v5 = vadd.f32 %v1062_v61, %v496_v4 }
  0xb0   : > { %779 = vrot.lane.b32.xlu1 %v497_v5, %s1147_s16 }
  0xb5   : > { %v498_v6 = vpop.f32.mrf.mxu0 }
  0xb6   : > { %v499_v7 = vadd.f32 %v1062_v61, %v498_v6 }
  0xb8   : > { %781 = vrot.lane.b32.xlu1 %v499_v7, %s1147_s16 }
  0xba   : > { %v541_v9 = vpop.f32.mrf.mxu1 }
  0xbb   : > { %v542_v10 = vadd.f32 %v541_v9, %v519_v8 }
  0xbd   : > { %v545_v11 = vmul.f32 0.35355338, %v542_v10  ;;  %v501_v12 = vpop.f32.mrf.mxu0 }
  0xbe   : > { %v502_v13 = vadd.f32 %v1062_v61, %v501_v12 }
  0xbf   : > { %v546_v14 = vperm.slane %v545_v11, 0 }
  0xc0   : > { %783 = vrot.lane.b32.xlu2 %v502_v13, %s1147_s16 }
  0xc1   : > { %v547_v15 = vmul.f32 %v546_v14, %v492_v0  ;;  %v548_v16 = vmul.f32 %v546_v14, %v494_v3  ;;  %v549_v23 = vmul.f32 %v546_v14, %v497_v5  ;;  %v550_v24 = vmul.f32 %v546_v14, %v499_v7 }
  0xc2   : > { %v543_v17 = vpop.f32.mrf.mxu1  ;;  %v551_v32 = vmul.f32 %v546_v14, %v502_v13 }
  0xc3   : > { %v556_v18 = vpack.c.bf16 %v548_v16, %v547_v15  ;;  %v557_v25 = vpack.c.bf16 %v550_v24, %v549_v23 }
  0xc5   : > { %v503_v19 = vpop.f32.mrf.mxu0  ;;  %973 = vmatmul.msk.bf16.vlgmr.msra.gmra.mxu2 %vm401_vm0, %v556_v18 }
  0xc6   : > { %v504_v20 = vadd.f32 %v1062_v61, %v503_v19 }
  0xc8   : > { %785 = vrot.lane.b32.xlu2 %v504_v20, %s1147_s16  ;;  %v552_v30 = vmul.f32 %v546_v14, %v504_v20 }
  0xca   : > { %v558_v33 = vpack.c.bf16 %v552_v30, %v551_v32 }
  0xcd   : > { %v506_v21 = vpop.f32.mrf.mxu0 }
  0xce   : > { %v507_v22 = vadd.f32 %v1062_v61, %v506_v21 }
  0xd0   : > { %787 = vrot.lane.b32.xlu0 %v507_v22, %s1147_s16  ;;  %v553_v36 = vmul.f32 %v546_v14, %v507_v22 }
  0xd5   : > { %v508_v26 = vpop.f32.mrf.mxu0  ;;  %974 = vmatmul.msk.bf16.gmra.mxu2 %vm401_vm0, %v557_v25 }
  0xd6   : > { %v509_v27 = vadd.f32 %v1062_v61, %v508_v26 }
  0xd8   : > { %789 = vrot.lane.b32.xlu1 %v509_v27, %s1147_s16  ;;  %v554_v35 = vmul.f32 %v546_v14, %v509_v27 }
  0xda   : > { %v559_v37 = vpack.c.bf16 %v554_v35, %v553_v36  ;;  %v714_v35 = vld [vmem:[%s1416_s2] sm:$0x3] }
  0xdd   : > { %v511_v28 = vpop.f32.mrf.mxu0 }
  0xde   : > { %v512_v29 = vadd.f32 %v1062_v61, %v511_v28 }
  0xe0   : > { %v555_v31 = vmul.f32 %v545_v11, %v512_v29  ;;  %829 = vrot.lane.b32.xlu2 %v512_v29, %s1147_s16 }
  0xe2   : > { %v560_v38 = vpack.c.bf16 %v555_v31, %v555_v31 }
  0xe5   : > { %975 = vmatmul.msk.bf16.gmra.mxu2 %vm401_vm0, %v558_v33  ;;  %v513_v34 = vpop.f32.mrf.mxu0 }
  0xf5   : > { %976 = vmatmul.msk.bf16.gmra.mxu2 %vm401_vm0, %v559_v37 }
 0x105   : > { %977 = vmatmul.msk.bf16.gmra.mxu2 %vm401_vm0, %v560_v38  ;;  %v732_v38 = vsel %vm730_vm2, %v714_v35, 0 }
 0x106   : > { %741 = vmatpush.bf16.msra.mxu3 %v732_v38 }
 0x148   : > { %v601_v39 = vpop.f32.mrf.mxu2 }
 0x149   : > { %v626_v52 = vsel %vm625_vm1, %v601_v39, -inf }
 0x150   : > { %v603_v40 = vpop.f32.mrf.mxu2 }
 0x151   : > { %v627_v47 = vsel %vm625_vm1, %v603_v40, -inf }
 0x158   : > { %v606_v41 = vpop.f32.mrf.mxu2 }
 0x159   : > { %v628_v53 = vsel %vm625_vm1, %v606_v41, -inf }
 0x160   : > { %v608_v42 = vpop.f32.mrf.mxu2 }
 0x161   : > { %v629_v54 = vsel %vm625_vm1, %v608_v42, -inf }
 0x168   : > { %v611_v43 = vpop.f32.mrf.mxu2 }
 0x169   : > { %v630_v48 = vsel %vm625_vm1, %v611_v43, -inf }
 0x16a   : > { %v631_v56 = vmax.f32 %v626_v52, %v630_v48 }
 0x170   : > { %v613_v44 = vpop.f32.mrf.mxu2 }
 0x171   : > { %v632_v46 = vsel %vm625_vm1, %v613_v44, -inf }
 0x172   : > { %v633_v50 = vmax.f32 %v627_v47, %v632_v46 }
 0x174   : > { %v638_v59 = vmax.f32 %v631_v56, %v633_v50 }
 0x178   : > { %v616_v45 = vpop.f32.mrf.mxu2 }
 0x179   : > { %v634_v49 = vsel %vm625_vm1, %v616_v45, -inf }
 0x17a   : > { %v635_v57 = vmax.f32 %v628_v53, %v634_v49 }
 0x180   : > { %v618_v51 = vpop.f32.mrf.mxu2 }
 0x181   : > { %v636_v55 = vsel %vm625_vm1, %v618_v51, -inf }
 0x182   : > { %v637_v58 = vmax.f32 %v629_v54, %v636_v55 }
 0x184   : > { %v639_v60 = vmax.f32 %v635_v57, %v637_v58 }
 0x186   : > { %v640_v61 = vmax.f32 %v638_v59, %v639_v60 }
 0x188   : > { %v641_v62 = vrot.slane %v640_v61, 4  ;;  %v621_v63 = vpop.f32.mrf.mxu2 }
 0x18a   : > { %v642_v0 = vmax.f32 %v640_v61, %v641_v62 }
 0x18c   : > { %v643_v1 = vrot.slane %v642_v0, 2 }
 0x18e   : > { %v644_v2 = vmax.f32 %v642_v0, %v643_v1 }
 0x190   : > { %v645_v3 = vrot.slane %v644_v2, 1  ;;  %v623_v4 = vpop.f32.mrf.mxu2 }
 0x192   : > { %v646_v5 = vmax.f32 %v644_v2, %v645_v3 }
 0x194   : > { %v647_v6 = vmax.f32 %v646_v5, %v621_v63 }
 0x196   : > { %v648_v7 = vperm.slane %v647_v6, 0  ;;  %v673_v47 = vsub.f32 %v621_v63, %v647_v6 }
 0x198   : > { %v649_v8 = vsub.f32 %v601_v39, %v648_v7  ;;  %v650_v9 = vsub.f32 %v603_v40, %v648_v7  ;;  %v651_v10 = vsub.f32 %v606_v41, %v648_v7  ;;  %v652_v11 = vsub.f32 %v608_v42, %v648_v7 }
 0x199   : > { %v653_v12 = vsub.f32 %v611_v43, %v648_v7  ;;  %v654_v16 = vsub.f32 %v613_v44, %v648_v7  ;;  %v655_v18 = vsub.f32 %v616_v45, %v648_v7  ;;  %v656_v20 = vsub.f32 %v618_v51, %v648_v7 }
 0x19a   : > { %v657_v13 = vmul.f32 1.442695, %v649_v8  ;;  %v659_v14 = vmul.f32 1.442695, %v650_v9  ;;  %v661_v15 = vmul.f32 1.442695, %v651_v10 }
 0x19b   : > { %v663_v17 = vmul.f32 1.442695, %v652_v11  ;;  %v665_v19 = vmul.f32 1.442695, %v653_v12  ;;  %v667_v21 = vmul.f32 1.442695, %v654_v16 }
 0x19c   : > { %1063 = vpow2.f32 %v657_v13  ;;  %v669_v22 = vmul.f32 1.442695, %v655_v18  ;;  %v671_v25 = vmul.f32 1.442695, %v656_v20  ;;  %v674_v51 = vmul.f32 1.442695, %v673_v47 }
 0x19d   : > { %1065 = vpow2.f32 %v659_v14  ;;  %v1002_v18 = vld [vmem:[%s1423_s9 + $0x8] sm:$0xff] }
 0x19e   : > { %1067 = vpow2.f32 %v661_v15  ;;  %v776_v15 = vpop.permute.xlu0 %775  ;;  %861 = vmatpush.bf16.msrb.mxu1 %v1002_v18 }
 0x19f   : > { %1069 = vpow2.f32 %v663_v17  ;;  %v780_v17 = vpop.permute.xlu1 %779 }
 0x1a0   : > { %1071 = vpow2.f32 %v665_v19  ;;  %v784_v19 = vpop.permute.xlu2 %783 }
 0x1a1   : > { %1073 = vpow2.f32 %v667_v21 }
 0x1a2   : > { %v1064_v23 = vpop.eup %1063  ;;  %1075 = vpow2.f32 %v669_v22 }
 0x1a3   : > { %v1066_v24 = vpop.eup %1065  ;;  %v676_v26 = vsel %vm625_vm1, %v1064_v23, 0.0  ;;  %1077 = vpow2.f32 %v671_v25 }
 0x1a4   : > { %v1068_v27 = vpop.eup %1067  ;;  %v677_v28 = vsel %vm625_vm1, %v1066_v24, 0.0  ;;  %1079 = vpow2.f32 %v674_v51 }
 0x1a5   : > { %v1070_v29 = vpop.eup %1069  ;;  %v678_v30 = vadd.f32 %v677_v28, %v676_v26  ;;  %v679_v31 = vsel %vm625_vm1, %v1068_v27, 0.0  ;;  %v1001_v26 = vld [vmem:[%s1423_s9] sm:$0xff] }
 0x1a6   : > { %v1072_v32 = vpop.eup %1071  ;;  %v681_v34 = vsel %vm625_vm1, %v1070_v29, 0.0  ;;  %v778_v20 = vpop.permute.xlu0 %777  ;;  %862 = vmatpush.bf16.msrb.mxu1 %v1001_v26 }
 0x1a7   : > { %v680_v33 = vadd.f32 %v679_v31, %v678_v30  ;;  %v1074_v36 = vpop.eup %1073  ;;  %v683_v39 = vsel %vm625_vm1, %v1072_v32, 0.0  ;;  %v782_v25 = vpop.permute.xlu1 %781 }
 0x1a8   : > { %v1076_v40 = vpop.eup %1075  ;;  %v685_v42 = vsel %vm625_vm1, %v1074_v36, 0.0 }
 0x1a9   : > { %v682_v37 = vadd.f32 %v681_v34, %v680_v33  ;;  %v1078_v43 = vpop.eup %1077  ;;  %v687_v45 = vsel %vm625_vm1, %v1076_v40, 0.0 }
 0x1aa   : > { %v689_v48 = vsel %vm625_vm1, %v1078_v43, 0.0  ;;  %v1080_v57 = vpop.eup %1079 }
 0x1ab   : > { %v684_v41 = vadd.f32 %v683_v39, %v682_v37 }
 0x1ad   : > { %v686_v44 = vadd.f32 %v685_v42, %v684_v41 }
 0x1ae   : > { %v788_v37 = vpop.permute.xlu0 %787 }
 0x1af   : > { %v688_v46 = vadd.f32 %v687_v45, %v686_v44  ;;  %v790_v45 = vpop.permute.xlu1 %789 }
 0x1b1   : > { %v690_v49 = vadd.f32 %v689_v48, %v688_v46 }
 0x1b3   : > { %v691_v50 = vrot.slane %v690_v49, 4 }
 0x1b5   : > { %v692_v52 = vadd.f32 %v691_v50, %v690_v49 }
 0x1b7   : > { %v693_v53 = vrot.slane %v692_v52, 2 }
 0x1b9   : > { %v694_v54 = vadd.f32 %v693_v53, %v692_v52 }
 0x1bb   : > { %v695_v55 = vrot.slane %v694_v54, 1 }
 0x1bd   : > { %v696_v56 = vadd.f32 %v695_v55, %v694_v54 }
 0x1bf   : > { %v697_v58 = vadd.f32 %v1080_v57, %v696_v56 }
 0x1c1   : > { %1081 = vrcp.f32 %v697_v58 }
 0x1c7   : > { %v1082_v59 = vpop.eup %1081 }
 0x1c8   : > { %v699_v60 = vperm.slane %v1082_v59, 0  ;;  %v708_v61 = vmul.f32 %v1082_v59, %v1080_v57 }
 0x1ca   : > { %v700_v62 = vmul.f32 %v1064_v23, %v699_v60  ;;  %v701_v0 = vmul.f32 %v1066_v24, %v699_v60  ;;  %v704_v63 = vmul.f32 %v1072_v32, %v699_v60  ;;  %v705_v1 = vmul.f32 %v1074_v36, %v699_v60  ;;  %v786_v32 = vpop.permute.xlu2 %785 }
 0x1cb   : > { %v706_v2 = vmul.f32 %v1076_v40, %v699_v60  ;;  %v707_v3 = vmul.f32 %v1078_v43, %v699_v60  ;;  %v702_v7 = vmul.f32 %v1068_v27, %v699_v60  ;;  %v703_v8 = vmul.f32 %v1070_v29, %v699_v60 }
 0x1cc   : > { %v709_v4 = vpack.c.bf16 %v701_v0, %v700_v62  ;;  %v711_v5 = vpack.c.bf16 %v705_v1, %v704_v63  ;;  %v713_v10 = vpack.c.bf16 %v708_v61, %v708_v61  ;;  %v839_v63 = vld [vmem:[%s1424_s10] sm:$0x1] }
 0x1cd   : > { %v712_v6 = vpack.c.bf16 %v707_v3, %v706_v2  ;;  %v710_v9 = vpack.c.bf16 %v703_v8, %v702_v7 }
 0x1ce   : > { %978 = vmatmul.msk.bf16.vlgmr.msra.gmra.mxu3 %vm625_vm1, %v709_v4 }
 0x1d2   : > { %v830_v58 = vpop.permute.xlu2 %829 }
 0x1de   : > { %979 = vmatmul.msk.bf16.gmra.mxu3 %vm625_vm1, %v710_v9 }
 0x1ee   : > { %980 = vmatmul.msk.bf16.gmra.mxu3 %vm625_vm1, %v711_v5 }
 0x1fe   : > { %981 = vmatmul.msk.bf16.gmra.mxu3 %vm625_vm1, %v712_v6 }
 0x20e   : > { %982 = vmatmul.msk.bf16.gmra.mxu3 %vm625_vm1, %v713_v10 }
 0x251   : > { %v743_v11 = vpop.f32.mrf.mxu3 }
 0x252   : > { %v799_v23 = vmul.f32 %v776_v15, %v743_v11 }
 0x254   : > { %v807_v29 = vsel %vm401_vm0, %v799_v23, 0.0 }
 0x259   : > { %v745_v12 = vpop.f32.mrf.mxu3 }
 0x25a   : > { %v800_v22 = vmul.f32 %v778_v20, %v745_v12 }
 0x25c   : > { %v808_v27 = vsel %vm401_vm0, %v800_v22, 0.0 }
 0x25d   : > { %v809_v33 = vadd.f32 %v808_v27, %v807_v29 }
 0x261   : > { %v748_v13 = vpop.f32.mrf.mxu3 }
 0x262   : > { %v801_v24 = vmul.f32 %v780_v17, %v748_v13 }
 0x264   : > { %v810_v30 = vsel %vm401_vm0, %v801_v24, 0.0 }
 0x265   : > { %v811_v38 = vadd.f32 %v810_v30, %v809_v33 }
 0x269   : > { %v750_v14 = vpop.f32.mrf.mxu3 }
 0x26a   : > { %v802_v28 = vmul.f32 %v782_v25, %v750_v14 }
 0x26c   : > { %v812_v35 = vsel %vm401_vm0, %v802_v28, 0.0 }
 0x26d   : > { %v813_v41 = vadd.f32 %v812_v35, %v811_v38 }
 0x271   : > { %v753_v16 = vpop.f32.mrf.mxu3 }
 0x272   : > { %v803_v31 = vmul.f32 %v784_v19, %v753_v16 }
 0x274   : > { %v814_v39 = vsel %vm401_vm0, %v803_v31, 0.0 }
 0x275   : > { %v815_v43 = vadd.f32 %v814_v39, %v813_v41 }
 0x279   : > { %v755_v21 = vpop.f32.mrf.mxu3 }
 0x27a   : > { %v804_v36 = vmul.f32 %v786_v32, %v755_v21 }
 0x27c   : > { %v816_v42 = vsel %vm401_vm0, %v804_v36, 0.0 }
 0x27d   : > { %v817_v46 = vadd.f32 %v816_v42, %v815_v43 }
 0x281   : > { %v758_v34 = vpop.f32.mrf.mxu3 }
 0x282   : > { %v805_v40 = vmul.f32 %v788_v37, %v758_v34 }
 0x284   : > { %v818_v44 = vsel %vm401_vm0, %v805_v40, 0.0 }
 0x285   : > { %v819_v49 = vadd.f32 %v818_v44, %v817_v46 }
 0x289   : > { %v760_v47 = vpop.f32.mrf.mxu3 }
 0x28a   : > { %v806_v48 = vmul.f32 %v790_v45, %v760_v47 }
 0x28c   : > { %v820_v50 = vsel %vm401_vm0, %v806_v48, 0.0 }
 0x28d   : > { %v821_v51 = vadd.f32 %v820_v50, %v819_v49 }
 0x28f   : > { %v822_v52 = vrot.slane %v821_v51, 4 }
 0x291   : > { %v823_v53 = vadd.f32 %v822_v52, %v821_v51  ;;  %v763_v54 = vpop.f32.mrf.mxu3 }
 0x292   : > { %v832_v60 = vmul.f32 %v830_v58, %v763_v54 }
 0x293   : > { %v824_v55 = vrot.slane %v823_v53, 2 }
 0x295   : > { %v825_v56 = vadd.f32 %v824_v55, %v823_v53 }
 0x297   : > { %v826_v57 = vrot.slane %v825_v56, 1 }
 0x299   : > { %v827_v59 = vadd.f32 %v826_v57, %v825_v56  ;;  %v765_v61 = vpop.f32.mrf.mxu3 }
 0x29b   : > { %v833_v62 = vadd.f32 %v832_v60, %v827_v59 }
 0x29d   : > { %v834_v0 = vpack.c.bf16 %v833_v62, %v833_v62 }
 0x29f   : > { %991 = vmatmul.msk.bf16.vlgmr.msrb.gmra.mxu1 %vm401_vm0, %v834_v0 }
 0x31c   : > { %v864_v1 = vpop.f32.mrf.mxu1 }
 0x31d   : > { %v865_v2 = vadd.f32 %v864_v1, %v839_v63 }
 0x31f   : > { %868 = vst [vmem:[%s378_s29] sm:$0x1] %v865_v2 }
 0x320   : > { %1110 = shalt.err (!%p1107_p3)
}
 0x321   : > { %1022 = dma.vmem_to_hbm [thread:$0]  (%p1246_p5), %s881_s30, 16, %s883_s12, %s870_s13  }
 0x324   : > { %v866_v3 = vpop.f32.mrf.mxu1 }
 0x325 PF: > { %p1028_p4 = scmp.ge.s32.totalorder %s1145_s20, 2  ;;  %s894_s14 = sand.u32 1, %s1133_s17  }
 0x326   : > { %s895_s22 = scalar_lea.sflag [#allocation3], %s894_s14 }
 0x327   : > { %p1025_p7 = pnand %p1028_p4, %p1250_p6 }
 0x329   : > { %p1026_p8 = pneg %p1025_p7 }
 0x32b   : > { %1128 = dma.done.wait (%p1026_p8), %s895_s22, 16  }
 0x32c   : > { %1130 = vsyncadd (%p1026_p8), %s895_s22, 4294967280  ;;  %s1434_s20 = sld [smem:[#allocation6_spill]]  ;;  %s1437_s17 = smov %s1137_s18 }
 0x32d   : > { %s1435_s25 = sld [smem:[#allocation5_spill]] }
 0x32e   : > { %s1436_s19 = sld [smem:[#allocation7_spill]] }
 0x332   : > { %p21_p9 = scmp.ge.s32.totalorder %s1434_s20, 4  }
 0x333   : > { %s1438_s18 = smov %s1435_s25 }
 0x334   :  { %23 = sbr.rel (!%p21_p9) target bundleno = 3 (0x3), region = 99 }
 0x339   :  { %900 = vsyncpa [#allocation3], 1 }
 0x33a   :  { %902 = vsyncpa [#allocation3 + $0x1], 1 }

</bundles_post_ra>
